<compile_context>
chip_gen: v7x
topology: tpu7x:2x2x1
jax: 0.10.0
libtpu: 0.0.40
codegen_flags: <defaults>
</compile_context>

<pallas_src>
import functools

import jax
import jax.numpy as jnp
from jax import lax
from jax.experimental import pallas as pl
from jax.experimental.pallas import tpu as pltpu


def _conv3x3_banded(xb, w_ref):
    """3x3 / stride-1 / pad-1 conv on lane-dense rows.

    xb    : (H, W*Ci) bf16 activations (lane index = w*Ci + ci)
    w_ref : (3, W*Ci, W*Co) bf16 banded weights (one band matrix per vertical tap dh)
    returns (H, W*Co) float32.
    """
    h = xb.shape[0]
    a0 = jnp.dot(xb, w_ref[0], preferred_element_type=jnp.float32)
    a1 = jnp.dot(xb, w_ref[1], preferred_element_type=jnp.float32)
    a2 = jnp.dot(xb, w_ref[2], preferred_element_type=jnp.float32)
    zero_row = jnp.zeros((1, a1.shape[1]), jnp.float32)
    # y[h] = a0[h-1] + a1[h] + a2[h+1]  (rows outside [0,H) are zero = vertical padding)
    down = jnp.concatenate([zero_row, a0[:h - 1]], axis=0)
    up = jnp.concatenate([a2[1:], zero_row], axis=0)
    return a1 + down + up


def se_basic_kernel(x_ref, w1_ref, bn1s_ref, bn1b_ref,
                    w2_ref, bn2s_ref, bn2b_ref, sew1_ref, sew2_ref, o_ref):
    # x_ref   : (1, H, W*Cin)  f32   lane-dense input (also the residual)
    # w1_ref  : (3, W*Cin,  W*Chid) bf16 banded conv1 weights
    # w2_ref  : (3, W*Chid, W*Cout) bf16 banded conv2 weights
    # bn*_ref : (1, W*C)     f32   folded BN scale/shift, tiled over w
    # sew1_ref: (Cse, W*Cout) f32  SE fc1 weights tiled over w, scaled by 1/(H*W)
    # sew2_ref: (Cse, W*Cout) f32  SE fc2 weights tiled over w
    # o_ref   : (1, H, W*Cout) f32
    x = x_ref[0]                                                   # (H, W*Cin) f32
    cse = sew1_ref.shape[0]

    # ---- conv1 + BN + ReLU ----
    y1 = _conv3x3_banded(x.astype(jnp.bfloat16), w1_ref)
    y1 = jnp.maximum(y1 * bn1s_ref[...] + bn1b_ref[...], 0.0)      # (H, W*Chid)

    # ---- conv2 + BN ----
    y2 = _conv3x3_banded(y1.astype(jnp.bfloat16), w2_ref)
    y2 = y2 * bn2s_ref[...] + bn2b_ref[...]                        # (H, W*Cout)

    # ---- Squeeze-and-Excitation (VPU): global-avg-pool folded into tiled FC weights ----
    colsum = jnp.sum(y2, axis=0, keepdims=True)                    # (1, W*Cout)
    gate_pre = jnp.zeros_like(colsum)
    for j in range(cse):                                           # Cse is tiny & static
        s_j = jnp.sum(colsum * sew1_ref[j:j + 1, :], axis=1, keepdims=True)   # (1, 1)
        gate_pre = gate_pre + jnp.maximum(s_j, 0.0) * sew2_ref[j:j + 1, :]
    gate = jax.nn.sigmoid(gate_pre)                                # (1, W*Cout), tiled per w

    # ---- residual add + ReLU (identity skip since Cin == Cout) ----
    o_ref[0] = jnp.maximum(x + y2 * gate, 0.0).astype(o_ref.dtype)


def _banded_conv_weights(w, width):
    """Lower HWIO (3,3,Ci,Co) conv weights to (3, width*Ci, width*Co) band matrices so that
    y[h] = sum_dh x_row[h+dh-1] @ big[dh] equals a 3x3 / pad-1 conv on lane-dense rows."""
    _, _, ci, co = w.shape
    w_in = jnp.arange(width)[:, None]
    w_out = jnp.arange(width)[None, :]
    dw = w_in - w_out + 1                                          # (width, width)
    valid = ((dw >= 0) & (dw <= 2)).astype(w.dtype)
    blocks = w[:, jnp.clip(dw, 0, 2)]                              # (3, Win, Wout, Ci, Co)
    blocks = blocks * valid[None, :, :, None, None]
    return blocks.transpose(0, 1, 3, 2, 4).reshape(3, width * ci, width * co)


def se_basic_forward(x_nchw, params):
    """x_nchw: (B, C, H, W) float32. Returns (B, C, H, W)."""
    (w1, bn1s, bn1b, w2, bn2s, bn2b, sew1, sew2) = params
    B, Cin, H, W = x_nchw.shape
    Chid = w1.shape[3]
    Cout = w2.shape[3]
    Cse = sew1.shape[1]
    assert Cin == Cout, "identity skip requires in_planes == out_planes"

    # NCHW -> NHWC -> lane-dense (B, H, W*C); the reshape is a free contiguous view (glue).
    x = jnp.transpose(x_nchw, (0, 2, 3, 1)).reshape(B, H, W * Cin)

    # Parameter preprocessing (tiny, one-off): banded conv weights in bf16, W-tiled BN / SE params.
    bw1 = _banded_conv_weights(w1, W).astype(jnp.bfloat16)         # (3, W*Cin,  W*Chid)
    bw2 = _banded_conv_weights(w2, W).astype(jnp.bfloat16)         # (3, W*Chid, W*Cout)
    bn1s_t = jnp.tile(bn1s, (1, W))                                # (1, W*Chid)
    bn1b_t = jnp.tile(bn1b, (1, W))
    bn2s_t = jnp.tile(bn2s, (1, W))                                # (1, W*Cout)
    bn2b_t = jnp.tile(bn2b, (1, W))
    sew1_t = jnp.tile(sew1.T, (1, W)) / float(H * W)               # (Cse, W*Cout), mean folded in
    sew2_t = jnp.tile(sew2, (1, W))                                # (Cse, W*Cout)

    out = pl.pallas_call(
        se_basic_kernel,
        out_shape=jax.ShapeDtypeStruct((B, H, W * Cout), jnp.float32),
        grid_spec=pltpu.PrefetchScalarGridSpec(
            num_scalar_prefetch=0,
            grid=(B,),
            in_specs=[
                pl.BlockSpec((1, H, W * Cin), lambda b: (b, 0, 0)),
                pl.BlockSpec((3, W * Cin, W * Chid), lambda b: (0, 0, 0)),
                pl.BlockSpec((1, W * Chid), lambda b: (0, 0)),
                pl.BlockSpec((1, W * Chid), lambda b: (0, 0)),
                pl.BlockSpec((3, W * Chid, W * Cout), lambda b: (0, 0, 0)),
                pl.BlockSpec((1, W * Cout), lambda b: (0, 0)),
                pl.BlockSpec((1, W * Cout), lambda b: (0, 0)),
                pl.BlockSpec((Cse, W * Cout), lambda b: (0, 0)),
                pl.BlockSpec((Cse, W * Cout), lambda b: (0, 0)),
            ],
            out_specs=pl.BlockSpec((1, H, W * Cout), lambda b: (b, 0, 0)),
        ),
        compiler_params=pltpu.CompilerParams(
            dimension_semantics=("parallel",)),                    # batch steps are independent
    )(x, bw1, bn1s_t, bn1b_t, bw2, bn2s_t, bn2b_t, sew1_t, sew2_t)

    return jnp.transpose(out.reshape(B, H, W, Cout), (0, 3, 1, 2))  # back to NCHW (glue)


def se_basic_reference(x_nchw, params):
    """Pure-JAX reference. Conv operands are rounded to bf16 to match the kernel's MXU dtype."""
    (w1, bn1s, bn1b, w2, bn2s, bn2b, sew1, sew2) = params
    rb = lambda a: a.astype(jnp.bfloat16).astype(jnp.float32)
    x = jnp.transpose(x_nchw, (0, 2, 3, 1))
    conv = functools.partial(lax.conv_general_dilated, window_strides=(1, 1),
                             padding="SAME",
                             dimension_numbers=("NHWC", "HWIO", "NHWC"))
    y = jnp.maximum(conv(rb(x), rb(w1)) * bn1s + bn1b, 0.0)
    y = conv(rb(y), rb(w2)) * bn2s + bn2b
    pooled = jnp.mean(y, axis=(1, 2))                              # (B, C)
    s = jnp.maximum(pooled @ sew1, 0.0)
    g = jax.nn.sigmoid(s @ sew2)
    y = y * g[:, None, None, :]
    out = jnp.maximum(x + y, 0.0)
    return jnp.transpose(out, (0, 3, 1, 2))


def make_params(key, in_planes, hidden_planes, out_planes, reduction):
    """Deterministic synthetic parameters (conv weights in HWIO, BN folded)."""
    ks = list(jax.random.split(key, 12))
    f32 = jnp.float32
    eps = 1e-5

    def folded_bn(kg, kb, km, kv, c):
        gamma = 1.0 + 0.1 * jax.random.normal(kg, (1, c), f32)
        beta = 0.1 * jax.random.normal(kb, (1, c), f32)
        rmean = 0.1 * jax.random.normal(km, (1, c), f32)
        rvar = 1.0 + 0.05 * jnp.abs(jax.random.normal(kv, (1, c), f32))
        scale = gamma / jnp.sqrt(rvar + eps)
        shift = beta - rmean * scale
        return scale, shift

    w1 = 0.1 * jax.random.normal(ks[0], (3, 3, in_planes, hidden_planes), f32)
    bn1s, bn1b = folded_bn(ks[1], ks[2], ks[3], ks[4], hidden_planes)
    w2 = 0.1 * jax.random.normal(ks[5], (3, 3, hidden_planes, out_planes), f32)
    bn2s, bn2b = folded_bn(ks[6], ks[7], ks[8], ks[9], out_planes)
    cse = out_planes // reduction
    sew1 = 0.3 * jax.random.normal(ks[10], (out_planes, cse), f32)   # Linear(planes, hidden).weight.T
    sew2 = 0.3 * jax.random.normal(ks[11], (cse, out_planes), f32)   # Linear(hidden, planes).weight.T
    return (w1, bn1s, bn1b, w2, bn2s, bn2b, sew1, sew2)


if __name__ == "__main__":
    B, C, H, W = 2, 8, 16, 16          # in_planes = hidden_planes = out_planes = 8 -> W*C = 128
    reduction = 4                      # SE hidden = 2

    root = jax.random.PRNGKey(0)
    kx, kp = jax.random.split(root)
    x = jax.random.normal(kx, (B, C, H, W), jnp.float32)
    params = make_params(kp, C, C, C, reduction)

    out = jax.block_until_ready(se_basic_forward(x, params))
    ref = jax.block_until_ready(se_basic_reference(x, params))

    assert out.shape == (B, C, H, W)
    err = float(jnp.max(jnp.abs(out - ref)))
    assert err < 1e-3, f"Pallas kernel mismatch vs JAX reference (max abs err = {err})"
    print("KERNEL_OK")
</pallas_src>

<mosaic_0001>
module attributes {stable_mosaic.version = 11 : i64} {
  func.func @se_basic_kernel(%arg0: i32, %arg1: memref<1x16x128xf32, #tpu.memory_space<vmem>>, %arg2: memref<3x128x128xbf16, #tpu.memory_space<vmem>>, %arg3: memref<1x128xf32, #tpu.memory_space<vmem>>, %arg4: memref<1x128xf32, #tpu.memory_space<vmem>>, %arg5: memref<3x128x128xbf16, #tpu.memory_space<vmem>>, %arg6: memref<1x128xf32, #tpu.memory_space<vmem>>, %arg7: memref<1x128xf32, #tpu.memory_space<vmem>>, %arg8: memref<2x128xf32, #tpu.memory_space<vmem>>, %arg9: memref<2x128xf32, #tpu.memory_space<vmem>>, %arg10: memref<1x16x128xf32, #tpu.memory_space<vmem>>) attributes {dimension_semantics = [#tpu.dimension_semantics<parallel>], iteration_bounds = array<i64: 2>, scalar_prefetch = 0 : i64, scratch_operands = 0 : i64, tpu.core_type = #tpu.core_type<tc>, window_params = [{transform_indices = @transform_0, window_bounds = array<i64: 1, 16, 128>}, {pipeline_mode = #tpu.pipeline_mode<synchronous>, transform_indices = @transform_1, window_bounds = array<i64: 3, 128, 128>}, {pipeline_mode = #tpu.pipeline_mode<synchronous>, transform_indices = @transform_2, window_bounds = array<i64: 1, 128>}, {pipeline_mode = #tpu.pipeline_mode<synchronous>, transform_indices = @transform_3, window_bounds = array<i64: 1, 128>}, {pipeline_mode = #tpu.pipeline_mode<synchronous>, transform_indices = @transform_4, window_bounds = array<i64: 3, 128, 128>}, {pipeline_mode = #tpu.pipeline_mode<synchronous>, transform_indices = @transform_5, window_bounds = array<i64: 1, 128>}, {pipeline_mode = #tpu.pipeline_mode<synchronous>, transform_indices = @transform_6, window_bounds = array<i64: 1, 128>}, {pipeline_mode = #tpu.pipeline_mode<synchronous>, transform_indices = @transform_7, window_bounds = array<i64: 2, 128>}, {pipeline_mode = #tpu.pipeline_mode<synchronous>, transform_indices = @transform_8, window_bounds = array<i64: 2, 128>}, {transform_indices = @transform_9, window_bounds = array<i64: 1, 16, 128>}]} {
    %c0 = arith.constant 0 : index
    %c0_0 = arith.constant 0 : index
    %c0_1 = arith.constant 0 : index
    %0 = vector.load %arg1[%c0, %c0_0, %c0_1] : memref<1x16x128xf32, #tpu.memory_space<vmem>>, vector<1x16x128xf32>
    %1 = vector.shape_cast %0 : vector<1x16x128xf32> to vector<16x128xf32>
    %2 = arith.truncf %1 : vector<16x128xf32> to vector<16x128xbf16>
    %c0_2 = arith.constant 0 : index
    %c0_3 = arith.constant 0 : index
    %c0_4 = arith.constant 0 : index
    %3 = vector.load %arg2[%c0_2, %c0_3, %c0_4] : memref<3x128x128xbf16, #tpu.memory_space<vmem>>, vector<1x128x128xbf16>
    %4 = vector.shape_cast %3 : vector<1x128x128xbf16> to vector<128x128xbf16>
    %cst = arith.constant dense<0.000000e+00> : vector<16x128xf32>
    %5 = tpu.matmul %2, %4, %cst {dimension_numbers = #tpu.dot_dimension_numbers<[1], [0], [0], [1], [0, 0, 1, 1], [], []>} : vector<16x128xbf16>, vector<128x128xbf16>, vector<16x128xf32> -> vector<16x128xf32>
    %c1 = arith.constant 1 : index
    %c0_5 = arith.constant 0 : index
    %c0_6 = arith.constant 0 : index
    %6 = vector.load %arg2[%c1, %c0_5, %c0_6] : memref<3x128x128xbf16, #tpu.memory_space<vmem>>, vector<1x128x128xbf16>
    %7 = vector.shape_cast %6 : vector<1x128x128xbf16> to vector<128x128xbf16>
    %cst_7 = arith.constant dense<0.000000e+00> : vector<16x128xf32>
    %8 = tpu.matmul %2, %7, %cst_7 {dimension_numbers = #tpu.dot_dimension_numbers<[1], [0], [0], [1], [0, 0, 1, 1], [], []>} : vector<16x128xbf16>, vector<128x128xbf16>, vector<16x128xf32> -> vector<16x128xf32>
    %c2 = arith.constant 2 : index
    %c0_8 = arith.constant 0 : index
    %c0_9 = arith.constant 0 : index
    %9 = vector.load %arg2[%c2, %c0_8, %c0_9] : memref<3x128x128xbf16, #tpu.memory_space<vmem>>, vector<1x128x128xbf16>
    %10 = vector.shape_cast %9 : vector<1x128x128xbf16> to vector<128x128xbf16>
    %cst_10 = arith.constant dense<0.000000e+00> : vector<16x128xf32>
    %11 = tpu.matmul %2, %10, %cst_10 {dimension_numbers = #tpu.dot_dimension_numbers<[1], [0], [0], [1], [0, 0, 1, 1], [], []>} : vector<16x128xbf16>, vector<128x128xbf16>, vector<16x128xf32> -> vector<16x128xf32>
    %cst_11 = arith.constant 0.000000e+00 : f32
    %12 = vector.broadcast %cst_11 : f32 to vector<1x128xf32>
    %13 = vector.extract_strided_slice %5 {offsets = [0, 0], sizes = [15, 128], strides = [1, 1]} : vector<16x128xf32> to vector<15x128xf32>
    %14 = tpu.concatenate %12, %13 in 0 : vector<1x128xf32>, vector<15x128xf32> -> vector<16x128xf32>
    %15 = vector.extract_strided_slice %11 {offsets = [1, 0], sizes = [15, 128], strides = [1, 1]} : vector<16x128xf32> to vector<15x128xf32>
    %16 = tpu.concatenate %15, %12 in 0 : vector<15x128xf32>, vector<1x128xf32> -> vector<16x128xf32>
    %17 = arith.addf %8, %14 : vector<16x128xf32>
    %18 = arith.addf %17, %16 : vector<16x128xf32>
    %c0_12 = arith.constant 0 : index
    %c0_13 = arith.constant 0 : index
    %19 = vector.load %arg3[%c0_12, %c0_13] : memref<1x128xf32, #tpu.memory_space<vmem>>, vector<1x128xf32>
    %20 = vector.broadcast %19 : vector<1x128xf32> to vector<16x128xf32>
    %21 = arith.mulf %18, %20 : vector<16x128xf32>
    %c0_14 = arith.constant 0 : index
    %c0_15 = arith.constant 0 : index
    %22 = vector.load %arg4[%c0_14, %c0_15] : memref<1x128xf32, #tpu.memory_space<vmem>>, vector<1x128xf32>
    %23 = vector.broadcast %22 : vector<1x128xf32> to vector<16x128xf32>
    %24 = arith.addf %21, %23 : vector<16x128xf32>
    %cst_16 = arith.constant 0.000000e+00 : f32
    %25 = vector.broadcast %cst_16 : f32 to vector<16x128xf32>
    %26 = arith.maximumf %24, %25 : vector<16x128xf32>
    %27 = arith.truncf %26 : vector<16x128xf32> to vector<16x128xbf16>
    %c0_17 = arith.constant 0 : index
    %c0_18 = arith.constant 0 : index
    %c0_19 = arith.constant 0 : index
    %28 = vector.load %arg5[%c0_17, %c0_18, %c0_19] : memref<3x128x128xbf16, #tpu.memory_space<vmem>>, vector<1x128x128xbf16>
    %29 = vector.shape_cast %28 : vector<1x128x128xbf16> to vector<128x128xbf16>
    %cst_20 = arith.constant dense<0.000000e+00> : vector<16x128xf32>
    %30 = tpu.matmul %27, %29, %cst_20 {dimension_numbers = #tpu.dot_dimension_numbers<[1], [0], [0], [1], [0, 0, 1, 1], [], []>} : vector<16x128xbf16>, vector<128x128xbf16>, vector<16x128xf32> -> vector<16x128xf32>
    %c1_21 = arith.constant 1 : index
    %c0_22 = arith.constant 0 : index
    %c0_23 = arith.constant 0 : index
    %31 = vector.load %arg5[%c1_21, %c0_22, %c0_23] : memref<3x128x128xbf16, #tpu.memory_space<vmem>>, vector<1x128x128xbf16>
    %32 = vector.shape_cast %31 : vector<1x128x128xbf16> to vector<128x128xbf16>
    %cst_24 = arith.constant dense<0.000000e+00> : vector<16x128xf32>
    %33 = tpu.matmul %27, %32, %cst_24 {dimension_numbers = #tpu.dot_dimension_numbers<[1], [0], [0], [1], [0, 0, 1, 1], [], []>} : vector<16x128xbf16>, vector<128x128xbf16>, vector<16x128xf32> -> vector<16x128xf32>
    %c2_25 = arith.constant 2 : index
    %c0_26 = arith.constant 0 : index
    %c0_27 = arith.constant 0 : index
    %34 = vector.load %arg5[%c2_25, %c0_26, %c0_27] : memref<3x128x128xbf16, #tpu.memory_space<vmem>>, vector<1x128x128xbf16>
    %35 = vector.shape_cast %34 : vector<1x128x128xbf16> to vector<128x128xbf16>
    %cst_28 = arith.constant dense<0.000000e+00> : vector<16x128xf32>
    %36 = tpu.matmul %27, %35, %cst_28 {dimension_numbers = #tpu.dot_dimension_numbers<[1], [0], [0], [1], [0, 0, 1, 1], [], []>} : vector<16x128xbf16>, vector<128x128xbf16>, vector<16x128xf32> -> vector<16x128xf32>
    %cst_29 = arith.constant 0.000000e+00 : f32
    %37 = vector.broadcast %cst_29 : f32 to vector<1x128xf32>
    %38 = vector.extract_strided_slice %30 {offsets = [0, 0], sizes = [15, 128], strides = [1, 1]} : vector<16x128xf32> to vector<15x128xf32>
    %39 = tpu.concatenate %37, %38 in 0 : vector<1x128xf32>, vector<15x128xf32> -> vector<16x128xf32>
    %40 = vector.extract_strided_slice %36 {offsets = [1, 0], sizes = [15, 128], strides = [1, 1]} : vector<16x128xf32> to vector<15x128xf32>
    %41 = tpu.concatenate %40, %37 in 0 : vector<15x128xf32>, vector<1x128xf32> -> vector<16x128xf32>
    %42 = arith.addf %33, %39 : vector<16x128xf32>
    %43 = arith.addf %42, %41 : vector<16x128xf32>
    %c0_30 = arith.constant 0 : index
    %c0_31 = arith.constant 0 : index
    %44 = vector.load %arg6[%c0_30, %c0_31] : memref<1x128xf32, #tpu.memory_space<vmem>>, vector<1x128xf32>
    %45 = vector.broadcast %44 : vector<1x128xf32> to vector<16x128xf32>
    %46 = arith.mulf %43, %45 : vector<16x128xf32>
    %c0_32 = arith.constant 0 : index
    %c0_33 = arith.constant 0 : index
    %47 = vector.load %arg7[%c0_32, %c0_33] : memref<1x128xf32, #tpu.memory_space<vmem>>, vector<1x128xf32>
    %48 = vector.broadcast %47 : vector<1x128xf32> to vector<16x128xf32>
    %49 = arith.addf %46, %48 : vector<16x128xf32>
    %cst_34 = arith.constant dense<0.000000e+00> : vector<128xf32>
    %50 = vector.multi_reduction <add>, %49, %cst_34 [0] : vector<16x128xf32> to vector<128xf32>
    %51 = vector.shape_cast %50 : vector<128xf32> to vector<1x128xf32>
    %cst_35 = arith.constant 0.000000e+00 : f32
    %52 = vector.broadcast %cst_35 : f32 to vector<1x128xf32>
    %c0_36 = arith.constant 0 : index
    %c0_37 = arith.constant 0 : index
    %53 = vector.load %arg8[%c0_36, %c0_37] : memref<2x128xf32, #tpu.memory_space<vmem>>, vector<1x128xf32>
    %54 = arith.mulf %51, %53 : vector<1x128xf32>
    %cst_38 = arith.constant dense<0.000000e+00> : vector<1xf32>
    %55 = vector.multi_reduction <add>, %54, %cst_38 [1] : vector<1x128xf32> to vector<1xf32>
    %56 = vector.shape_cast %55 : vector<1xf32> to vector<1x1xf32>
    %cst_39 = arith.constant 0.000000e+00 : f32
    %57 = vector.broadcast %cst_39 : f32 to vector<1x1xf32>
    %58 = arith.maximumf %56, %57 : vector<1x1xf32>
    %c0_40 = arith.constant 0 : index
    %c0_41 = arith.constant 0 : index
    %59 = vector.load %arg9[%c0_40, %c0_41] : memref<2x128xf32, #tpu.memory_space<vmem>>, vector<1x128xf32>
    %60 = vector.broadcast %58 : vector<1x1xf32> to vector<1x128xf32>
    %61 = arith.mulf %60, %59 : vector<1x128xf32>
    %62 = arith.addf %52, %61 : vector<1x128xf32>
    %c1_42 = arith.constant 1 : index
    %c0_43 = arith.constant 0 : index
    %63 = vector.load %arg8[%c1_42, %c0_43] : memref<2x128xf32, #tpu.memory_space<vmem>>, vector<1x128xf32>
    %64 = arith.mulf %51, %63 : vector<1x128xf32>
    %cst_44 = arith.constant dense<0.000000e+00> : vector<1xf32>
    %65 = vector.multi_reduction <add>, %64, %cst_44 [1] : vector<1x128xf32> to vector<1xf32>
    %66 = vector.shape_cast %65 : vector<1xf32> to vector<1x1xf32>
    %cst_45 = arith.constant 0.000000e+00 : f32
    %67 = vector.broadcast %cst_45 : f32 to vector<1x1xf32>
    %68 = arith.maximumf %66, %67 : vector<1x1xf32>
    %c1_46 = arith.constant 1 : index
    %c0_47 = arith.constant 0 : index
    %69 = vector.load %arg9[%c1_46, %c0_47] : memref<2x128xf32, #tpu.memory_space<vmem>>, vector<1x128xf32>
    %70 = vector.broadcast %68 : vector<1x1xf32> to vector<1x128xf32>
    %71 = arith.mulf %70, %69 : vector<1x128xf32>
    %72 = arith.addf %62, %71 : vector<1x128xf32>
    %73 = arith.negf %72 : vector<1x128xf32>
    %74 = math.exp %73 : vector<1x128xf32>
    %cst_48 = arith.constant 1.000000e+00 : f32
    %75 = vector.broadcast %cst_48 : f32 to vector<1x128xf32>
    %76 = arith.addf %75, %74 : vector<1x128xf32>
    %77 = arith.divf %75, %76 : vector<1x128xf32>
    %78 = vector.broadcast %77 : vector<1x128xf32> to vector<16x128xf32>
    %79 = arith.mulf %49, %78 : vector<16x128xf32>
    %80 = arith.addf %1, %79 : vector<16x128xf32>
    %cst_49 = arith.constant 0.000000e+00 : f32
    %81 = vector.broadcast %cst_49 : f32 to vector<16x128xf32>
    %82 = arith.maximumf %80, %81 : vector<16x128xf32>
    %c0_50 = arith.constant 0 : index
    %c0_51 = arith.constant 0 : index
    %c0_52 = arith.constant 0 : index
    %83 = vector.load %arg10[%c0_50, %c0_51, %c0_52] : memref<1x16x128xf32, #tpu.memory_space<vmem>>, vector<1x16x128xf32>
    %84 = vector.shape_cast %83 : vector<1x16x128xf32> to vector<16x128xf32>
    %85 = vector.shape_cast %82 : vector<16x128xf32> to vector<1x16x128xf32>
    tpu.vector_store %arg10[%c0_50, %c0_51, %c0_52], %85 {strides = array<i32>} : memref<1x16x128xf32, #tpu.memory_space<vmem>>, vector<1x16x128xf32>,
    return
  }
  func.func @transform_0(%arg0: i32) -> (i32, i32, i32) {
    %c0_i32 = arith.constant 0 : i32
    %c0_i32_0 = arith.constant 0 : i32
    %c0_i32_1 = arith.constant 0 : i32
    return %arg0, %c0_i32, %c0_i32_0 : i32, i32, i32
  }
  func.func @transform_1(%arg0: i32) -> (i32, i32, i32) {
    %c0_i32 = arith.constant 0 : i32
    %c0_i32_0 = arith.constant 0 : i32
    %c0_i32_1 = arith.constant 0 : i32
    %c0_i32_2 = arith.constant 0 : i32
    return %c0_i32, %c0_i32_0, %c0_i32_1 : i32, i32, i32
  }
  func.func @transform_2(%arg0: i32) -> (i32, i32) {
    %c0_i32 = arith.constant 0 : i32
    %c0_i32_0 = arith.constant 0 : i32
    %c0_i32_1 = arith.constant 0 : i32
    return %c0_i32, %c0_i32_0 : i32, i32
  }
  func.func @transform_3(%arg0: i32) -> (i32, i32) {
    %c0_i32 = arith.constant 0 : i32
    %c0_i32_0 = arith.constant 0 : i32
    %c0_i32_1 = arith.constant 0 : i32
    return %c0_i32, %c0_i32_0 : i32, i32
  }
  func.func @transform_4(%arg0: i32) -> (i32, i32, i32) {
    %c0_i32 = arith.constant 0 : i32
    %c0_i32_0 = arith.constant 0 : i32
    %c0_i32_1 = arith.constant 0 : i32
    %c0_i32_2 = arith.constant 0 : i32
    return %c0_i32, %c0_i32_0, %c0_i32_1 : i32, i32, i32
  }
  func.func @transform_5(%arg0: i32) -> (i32, i32) {
    %c0_i32 = arith.constant 0 : i32
    %c0_i32_0 = arith.constant 0 : i32
    %c0_i32_1 = arith.constant 0 : i32
    return %c0_i32, %c0_i32_0 : i32, i32
  }
  func.func @transform_6(%arg0: i32) -> (i32, i32) {
    %c0_i32 = arith.constant 0 : i32
    %c0_i32_0 = arith.constant 0 : i32
    %c0_i32_1 = arith.constant 0 : i32
    return %c0_i32, %c0_i32_0 : i32, i32
  }
  func.func @transform_7(%arg0: i32) -> (i32, i32) {
    %c0_i32 = arith.constant 0 : i32
    %c0_i32_0 = arith.constant 0 : i32
    %c0_i32_1 = arith.constant 0 : i32
    return %c0_i32, %c0_i32_0 : i32, i32
  }
  func.func @transform_8(%arg0: i32) -> (i32, i32) {
    %c0_i32 = arith.constant 0 : i32
    %c0_i32_0 = arith.constant 0 : i32
    %c0_i32_1 = arith.constant 0 : i32
    return %c0_i32, %c0_i32_0 : i32, i32
  }
  func.func @transform_9(%arg0: i32) -> (i32, i32, i32) {
    %c0_i32 = arith.constant 0 : i32
    %c0_i32_0 = arith.constant 0 : i32
    %c0_i32_1 = arith.constant 0 : i32
    return %arg0, %c0_i32, %c0_i32_0 : i32, i32, i32
  }
}

</mosaic_0001>

<bundles_post_ra>
// kernel: tpu_custom_call.1
= control target key start
LH: loop header
LB: loop body
LE: loop exit
PB: predicated region body
PF: predicated region fallthrough
CT: control target
= control target key end

     0   :  { %14 = vsyncpa [#allocation3], 0  ;;  %s2182_s0 = inlined_call_operand.hbm [shape: f32[2,16,128], index: 0, kind: input, shape index: {}]   ;;  %s2183_s1 = inlined_call_operand.hbm [shape: bf16[3,128,128], index: 1, kind: input, shape index: {}]   ;;  %s2184_s2 = inlined_call_operand.vmem [shape: f32[1,128], index: 2, kind: input, shape index: {}]   ;;  %s2185_s3 = inlined_call_operand.vmem [shape: f32[1,128], index: 3, kind: input, shape index: {}]   ;;  %s2186_s4 = inlined_call_operand.hbm [shape: bf16[3,128,128], index: 4, kind: input, shape index: {}]   ;;  %s2187_s5 = inlined_call_operand.vmem [shape: f32[1,128], index: 5, kind: input, shape index: {}]   ;;  %s2188_s6 = inlined_call_operand.vmem [shape: f32[1,128], index: 6, kind: input, shape index: {}]   ;;  %s2189_s7 = inlined_call_operand.vmem [shape: f32[2,128], index: 7, kind: input, shape index: {}]   ;;  %s2190_s8 = inlined_call_operand.vmem [shape: f32[2,128], index: 8, kind: input, shape index: {}]   ;;  %s2191_s9 = inlined_call_operand.hbm [shape: f32[2,16,128], index: 9, kind: output, shape index: {}]  }
   0x1   :  { %16 = vsyncpa [#allocation3 + $0x1], 0 }
   0x2   :  { %17 = vsyncpa [#allocation6], 0 }
   0x3   :  { %18 = vsyncpa [#allocation4], 0 }
   0x4   :  { %20 = vsyncpa [#allocation4 + $0x1], 0  ;;  %s1838_s30 = smov 0   ;;  %s1840_s10 = smov 0  }
   0x5   :  { %s1842_s11 = smov 0   ;;  %s1844_s12 = smov 0  }
   0x6 LB: > { %s1859_s13 = sadd.s32 4294967295, %s1774_s12   ;;  %s1244_s14 = sadd.s32 4294967294, %s1774_s12   ;;  %s1774_s12 = sphi %s1844_s12, %s2214_s12   ;;  %s1770_s11 = sphi %s1842_s11, %s2213_s11   ;;  %s1766_s10 = sphi %s1840_s10, %s2212_s10   ;;  %s1762_s30 = sphi %s1838_s30, %s2211_s30  }
   0x7   : > { %p46_p0 = scmp.ne.s32.totalorder %s1766_s10, %s1762_s30  ;;  %p2192_p1 = scmp.eq.s32.totalorder %s1859_s13, 0 }
   0x8   : > { %p244_p3 = scmp.eq.s32.totalorder %s1244_s14, 1  ;;  %p1245_p5 = scmp.ge.s32.totalorder %s1774_s12, 1 }
   0x9   : > { %p1868_p4 = por %p2192_p1, %p46_p0  ;;  %p251_p7 = scmp.lt.s32.totalorder %s1774_s12, 3 }
   0xa   : > { %p1873_p6 = por %p244_p3, %p46_p0  ;;  %s1776_s18 = smov [#allocation5]  }
   0xb   : > { %s2196_s15 = scalar_select %p1868_p4, 1, 0 }
   0xc   : > { %s2197_s16 = scalar_select %p1873_p6, 1, 0 }
   0xd   : > { %p1878_p8 = pnand %p1245_p5, %p251_p7  ;;  %s263_s19 = sshll.u32 %s1776_s18, 4  ;;  %s1882_s19 = int_to_ptr.vmem [resolvable:$true] %s263_s19 }
   0xe   : > { %2198 = sst [smem:[#allocation12_spill]] %s2197_s16  ;;  %s1777_s21 = smov [#allocation7]  }
   0xf   : > { %p1503_p9 = pneg %p1878_p8  ;;  %s282_s22 = sshll.u32 %s1777_s21, 4  ;;  %s1893_s22 = int_to_ptr.vmem [resolvable:$true] %s282_s22 }
  0x10   : > { %s1618_s25 = scalar_lea.hbm %s2183_s1, 3072 }
  0x11   : > { %p1889_p11 = pnand %p1503_p9, %p2192_p1  ;;  %p1619_p12 = scmp.ne.s32.totalorder %s2183_s1, %s1618_s25 }
  0x12   : > { %p1625_p5 = scmp.lt.u32.totalorder %s1618_s25, %s2183_s1 }
  0x13   : > { %p1620_p13 = pneg %p1889_p11 }
  0x15   : > { %p1621_p0 = pnand %p1620_p13, %p1619_p12 }
  0x17   : > { %p1622_p3 = pneg %p1621_p0 }
  0x19   : > { %p1627_p7 = pnand %p1625_p5, %p1622_p3 }
  0x1b   : > { %1630 = shalt.err (!%p1627_p7)
}
  0x1c   : > { %s1631_s14 = scalar_lea.vmem %s1882_s19, 3072  ;;  %p1639_p2 = scmp.lt.s32.totalorder %s1882_s19, %s1882_s19 }
  0x1d   : > { %p1632_p9 = scmp.ne.s32.totalorder %s1882_s19, %s1631_s14  ;;  %p1640_p12 = scmp.lt.s32.totalorder %s1631_s14, %s1631_s14 }
  0x1f   : > { %p1634_p10 = pnand %p1632_p9, %p1620_p13  ;;  %p1641_p0 = por %p1640_p12, %p1639_p2 }
  0x21   : > { %p1635_p1 = pneg %p1634_p10 }
  0x23   : > { %p1642_p6 = pnand %p1641_p0, %p1635_p1 }
  0x25   : > { %1645 = shalt.err (!%p1642_p6)
}
  0x26   : > { %s1778_s18 = smov 64   ;;  %s1779_s21 = smov 4  }
  0x27   : > { %1506 = dma.hbm_to_vmem [thread:$0]  (!%p1889_p11), %s2183_s1, 3072, %s1882_s19, [#allocation6], %s1778_s18, %s1778_s18, %s1779_s21  }
  0x28   : > { %s1646_s27 = scalar_lea.hbm %s2186_s4, 3072 }
  0x29   : > { %p1647_p2 = scmp.ne.s32.totalorder %s2186_s4, %s1646_s27  ;;  %p1653_p10 = scmp.lt.u32.totalorder %s1646_s27, %s2186_s4 }
  0x2b   : > { %p1649_p1 = pnand %p1647_p2, %p1620_p13 }
  0x2d   : > { %p1650_p6 = pneg %p1649_p1 }
  0x2f   : > { %p1655_p3 = pnand %p1653_p10, %p1650_p6 }
  0x31   : > { %1658 = shalt.err (!%p1655_p3)
}
  0x32   : > { %s1659_s19 = scalar_lea.vmem %s1893_s22, 3072  ;;  %p1667_p12 = scmp.lt.s32.totalorder %s1893_s22, %s1893_s22 }
  0x33   : > { %p1660_p5 = scmp.ne.s32.totalorder %s1893_s22, %s1659_s19  ;;  %p1668_p0 = scmp.lt.s32.totalorder %s1659_s19, %s1659_s19 }
  0x35   : > { %p1662_p7 = pnand %p1660_p5, %p1620_p13  ;;  %p1669_p2 = por %p1668_p0, %p1667_p12 }
  0x37   : > { %p1663_p9 = pneg %p1662_p7 }
  0x39   : > { %p1670_p1 = pnand %p1669_p2, %p1663_p9 }
  0x3b   : > { %1673 = shalt.err (!%p1670_p1)
}
  0x3c   : > { %1509 = dma.hbm_to_vmem [thread:$0]  (!%p1889_p11), %s2186_s4, 3072, %s1893_s22, [#allocation6], %s1778_s18, %s1778_s18, %s1779_s21  }
  0x3d   : > { %s1948_s24 = sadd.s32 1, %s1774_s12   ;;  %s33_s20 = sadd.s32 1, %s1770_s11 }
  0x3e   : > { %s30_s25 = ssub.s32 %s1774_s12, %s1948_s24  ;;  %p40_p13 = scmp.ne.s32.totalorder %s1770_s11, %s1766_s10 }
  0x3f   : > { %p31_p6 = scmp.eq.s32.totalorder %s30_s25, 0  ;;  %p41_p10 = scmp.eq.s32.totalorder %s1774_s12, 0 }
  0x40   : > { %p2201_p3 = scmp.eq.s32.totalorder %s1859_s13, 1  ;;  %p1520_p7 = scmp.lt.s32.totalorder %s1774_s12, 2 }
  0x41   : > { %s1964_s27 = scalar_select %p31_p6, %s1770_s11, %s33_s20  }
  0x42   : > { %p1958_p5 = por %p2201_p3, %p40_p13  ;;  %p42_p9 = por %p41_p10, %p40_p13 }
  0x43   : > { %s308_s28 = sand.u32 1, %s1770_s11   ;;  %s1315_s22 = sshll.u32 %s1774_s12, 8 }
  0x44   : > { %s2202_s26 = scalar_select %p1958_p5, 1, 0 }
  0x45   : > { %s1249_s29 = sshll.u32 %s308_s28, 4  ;;  %s1971_s14 = scalar_lea.hbm %s2182_s0, %s1315_s22 }
  0x46   : > { %s312_s19 = scalar_lea.vmem [#allocation2], %s1249_s29  ;;  %p1975_p11 = pnand %p1520_p7, %p42_p9 }
  0x47   : > { %s319_s16 = sshll.u32 %s312_s19, 4  ;;  %s1979_s20 = scalar_lea.sflag [#allocation3], %s308_s28  ;;  %s1973_s16 = int_to_ptr.vmem [resolvable:$true] %s319_s16 }
  0x48   : > { %s1674_s25 = scalar_lea.hbm %s1971_s14, 256  ;;  %p1676_p0 = pneg %p1975_p11 }
  0x49   : > { %p1675_p12 = scmp.ne.s32.totalorder %s1971_s14, %s1674_s25  ;;  %s1679_s18 = scalar_lea.hbm %s2182_s0, 512 }
  0x4a   : > { %p1680_p13 = scmp.lt.u32.totalorder %s1971_s14, %s2182_s0  ;;  %p1681_p6 = scmp.lt.u32.totalorder %s1679_s18, %s1674_s25 }
  0x4b   : > { %p1677_p2 = pnand %p1676_p0, %p1675_p12  ;;  %p1683_p3 = scmp.lt.u32.totalorder %s1674_s25, %s1971_s14 }
  0x4c   : > { %p1682_p10 = por %p1681_p6, %p1680_p13 }
  0x4d   : > { %p1678_p1 = pneg %p1677_p2 }
  0x4e   : > { %p1684_p7 = por %p1683_p3, %p1682_p10 }
  0x50   : > { %p1685_p9 = pnand %p1684_p7, %p1678_p1 }
  0x52   : > { %1688 = shalt.err (!%p1685_p9)
}
  0x53   : > { %s1689_s28 = scalar_lea.vmem %s1973_s16, 256  ;;  %s1780_s29 = smov [#allocation2]  }
  0x54   : > { %p1690_p12 = scmp.ne.s32.totalorder %s1973_s16, %s1689_s28  ;;  %s1694_s22 = sshll.u32 %s1780_s29, 4  ;;  %s1695_s22 = int_to_ptr.vmem [resolvable:$false] %s1694_s22 }
  0x55   : > { %s1696_s21 = scalar_lea.vmem %s1695_s22, 512  ;;  %p1697_p4 = scmp.lt.s32.totalorder %s1973_s16, %s1695_s22 }
  0x56   : > { %p1692_p2 = pnand %p1690_p12, %p1676_p0  ;;  %p1698_p13 = scmp.lt.s32.totalorder %s1696_s21, %s1689_s28 }
  0x58   : > { %p1693_p5 = pneg %p1692_p2  ;;  %p1699_p6 = por %p1698_p13, %p1697_p4 }
  0x5a   : > { %p1700_p10 = pnand %p1699_p6, %p1693_p5 }
  0x5c   : > { %1703 = shalt.err (!%p1700_p10)
}
  0x5d   : > { %s1781_s25 = smov 128   ;;  %s1782_s18 = smov 8  }
  0x5e   : > { %1513 = dma.hbm_to_vmem [thread:$0]  (!%p1975_p11), %s1971_s14, 256, %s1973_s16, %s1979_s20, %s1781_s25, %s1781_s25, %s1782_s18  }
  0x5f   : > { %331 = sbr.rel (%p1878_p8) target bundleno = 870 (0x366), region = 56  ;;  %s2010_s19 = sand.u32 (!%p1878_p8), 1, %s1766_s10  }
  0x60   : > { %s1253_s28 = sshll.u32 (!%p1878_p8), %s2010_s19, 4  ;;  %s334_s29 = scalar_lea.sflag (!%p1878_p8), [#allocation3], %s2010_s19 }
  0x61   : > { %s2016_s22 = scalar_lea.vmem (!%p1878_p8), [#allocation2], %s1253_s28  ;;  %p2204_p4 = scmp.ne.s32.totalorder (!%p1878_p8), %s2196_s15, 0 }
  0x66   : > { %1749 = dma.done.wait (%p2204_p4), %s334_s29, 256  }
  0x67   : > { %1751 = vsyncadd (%p2204_p4), %s334_s29, 4294967040  ;;  %p2205_p5 = scmp.eq.s32.totalorder %s1859_s13, 0 }
  0x69   : > { %1753 = dma.done.wait (%p2205_p5), [#allocation6], 6144   ;;  %p2206_p8 = pmov %p2205_p5 }
  0x6a   : > { %v1783_v0 = vmov 0.0   ;;  %vm1784_vm0 = vmmov 0   ;;  %v1566_v1 = vld [vmem:[#allocation5] sm:$0xff]   ;;  %v1567_v2 = vld [vmem:[#allocation5 + $0x8] sm:$0xff]   ;;  %v1568_v3 = vld [vmem:[#allocation5 + $0x10] sm:$0xff]   ;;  %vm614_vm1 = vcmask 1040384  }
  0x6b   : > { %1755 = vsyncadd (%p2206_p8), [#allocation6], 4294961152  ;;  %1371 = vmatprep.subr.bf16.mxu0 %v1783_v0  ;;  %1391 = vmatprep.subr.bf16.mxu1 %v1783_v0  ;;  %v1574_v4 = vld [vmem:[#allocation5 + $0x80] sm:$0xff]   ;;  %v1569_v5 = vld [vmem:[#allocation5 + $0x18] sm:$0xff]   ;;  %vm623_vm2 = vcmask 1046528   ;;  %s1316_s20 = sshll.u32 %s1859_s13, 8 }
  0x6c   : > { %1387 = vmatprep.mubr.msk.bf16.mxu0 %vm1784_vm0, %v1783_v0  ;;  %1407 = vmatprep.mubr.msk.bf16.mxu1 %vm1784_vm0, %v1783_v0  ;;  %v1575_v6 = vld [vmem:[#allocation5 + $0x88] sm:$0xff]   ;;  %v1570_v7 = vld [vmem:[#allocation5 + $0x20] sm:$0xff]   ;;  %v1577_v8 = vld [vmem:[#allocation5 + $0x90] sm:$0xff]   ;;  %s379_s21 = scalar_lea.vmem [#allocation8], %s1253_s28  ;;  %s1139_s13 = scalar_lea.sflag [#allocation4], %s2010_s19 }
  0x6d   : > { %1372 = vmatpush3.bf16.msra.mxu0 %v1566_v1  ;;  %1392 = vmatpush3.bf16.msra.mxu1 %v1574_v4  ;;  %v1571_v9 = vld [vmem:[#allocation5 + $0x28] sm:$0xff]   ;;  %v1579_v10 = vld [vmem:[#allocation5 + $0x98] sm:$0xff]   ;;  %v1572_v11 = vld [vmem:[#allocation5 + $0x30] sm:$0xff]   ;;  %s1152_s25 = sshll.u32 %s379_s21, 4  ;;  %p2207_p0 = scmp.ne.s32.totalorder %s2202_s26, 0  ;;  %s2138_s25 = int_to_ptr.vmem [resolvable:$true] %s1152_s25 }
  0x6e   : > { %1373 = vmatprep.subr.bf16.mxu0 %v1783_v0  ;;  %1393 = vmatprep.subr.bf16.mxu1 %v1783_v0  ;;  %v1581_v12 = vld [vmem:[#allocation5 + $0xa0] sm:$0xff]   ;;  %v1573_v13 = vld [vmem:[#allocation5 + $0x38] sm:$0xff]   ;;  %v1583_v16 = vld [vmem:[#allocation5 + $0xa8] sm:$0xff]   ;;  %s1704_s28 = scalar_lea.vmem %s2138_s25, 256  ;;  %s1785_s15 = smov [#allocation8]  }
  0x6f   : > { %v2043_v14 = vld [vmem:[%s2016_s22] sm:$0xff]  ;;  %v2046_v15 = vld [vmem:[%s2016_s22 + $0x8] sm:$0xff]  ;;  %s2136_s22 = scalar_lea.hbm %s2191_s9, %s1316_s20  ;;  %p1705_p11 = scmp.ne.s32.totalorder %s2138_s25, %s1704_s28 }
  0x70   : > { %v1576_v17 = vld [vmem:[#allocation5 + $0x40] sm:$0xff]   ;;  %v1585_v18 = vld [vmem:[#allocation5 + $0xb0] sm:$0xff]   ;;  %v383_v19 = vpack.c.bf16 %v2046_v15, %v2043_v14  ;;  %v1578_v20 = vld [vmem:[#allocation5 + $0x48] sm:$0xff]   ;;  %s1708_s17 = sshll.u32 %s1785_s15, 4  ;;  %s1709_s17 = int_to_ptr.vmem [resolvable:$false] %s1708_s17 }
  0x71   : > { %1374 = vmatpush3.bf16.msra.mxu0 %v1567_v2  ;;  %1394 = vmatpush3.bf16.msra.mxu1 %v1575_v6  ;;  %v1587_v21 = vld [vmem:[#allocation5 + $0xb8] sm:$0xff]   ;;  %v1580_v22 = vld [vmem:[#allocation5 + $0x50] sm:$0xff]   ;;  %v1584_v24 = vld [vmem:[#allocation5 + $0x60] sm:$0xff]   ;;  %p1706_p1 = pnand %p1705_p11, %p2207_p0  ;;  %s1710_s14 = scalar_lea.vmem %s1709_s17, 512 }
  0x72   : > { %1375 = vmatprep.subr.bf16.mxu0 %v1783_v0  ;;  %1395 = vmatprep.subr.bf16.mxu1 %v1783_v0  ;;  %v1582_v23 = vld [vmem:[#allocation5 + $0x58] sm:$0xff]   ;;  %v1586_v25 = vld [vmem:[#allocation5 + $0x68] sm:$0xff]   ;;  %v1588_v26 = vld [vmem:[#allocation5 + $0x70] sm:$0xff]   ;;  %p1711_p7 = scmp.lt.s32.totalorder %s2138_s25, %s1709_s17  ;;  %p1712_p9 = scmp.lt.s32.totalorder %s1710_s14, %s1704_s28 }
  0x73   : > { %v1589_v27 = vld [vmem:[#allocation5 + $0x78] sm:$0xff]   ;;  %v1590_v28 = vld [vmem:[#allocation7] sm:$0xff]   ;;  %v1592_v30 = vld [vmem:[#allocation7 + $0x8] sm:$0xff]   ;;  %p1707_p3 = pneg %p1706_p1 }
  0x74   : > { %v1591_v29 = vld [vmem:[#allocation7 + $0x80] sm:$0xff]   ;;  %v1593_v31 = vld [vmem:[#allocation7 + $0x88] sm:$0xff]   ;;  %v1594_v32 = vld [vmem:[#allocation7 + $0x10] sm:$0xff]   ;;  %p1713_p12 = por %p1712_p9, %p1711_p7 }
  0x75   : > { %1376 = vmatpush3.bf16.msra.mxu0 %v1568_v3  ;;  %1396 = vmatpush3.bf16.msra.mxu1 %v1577_v8  ;;  %v1595_v33 = vld [vmem:[#allocation7 + $0x90] sm:$0xff]   ;;  %v1596_v34 = vld [vmem:[#allocation7 + $0x18] sm:$0xff]   ;;  %v1598_v36 = vld [vmem:[#allocation7 + $0x20] sm:$0xff]  }
  0x76   : > { %1377 = vmatprep.subr.bf16.mxu0 %v1783_v0  ;;  %1397 = vmatprep.subr.bf16.mxu1 %v1783_v0  ;;  %v1597_v35 = vld [vmem:[#allocation7 + $0x98] sm:$0xff]   ;;  %v1599_v37 = vld [vmem:[#allocation7 + $0xa0] sm:$0xff]   ;;  %v1600_v38 = vld [vmem:[#allocation7 + $0x28] sm:$0xff]   ;;  %p1714_p2 = pnand %p1713_p12, %p1707_p3 }
  0x77   : > { %v1601_v39 = vld [vmem:[#allocation7 + $0xa8] sm:$0xff]   ;;  %v1602_v40 = vld [vmem:[#allocation7 + $0x30] sm:$0xff]   ;;  %v1604_v42 = vld [vmem:[#allocation7 + $0x38] sm:$0xff]  }
  0x78   : > { %v1603_v41 = vld [vmem:[#allocation7 + $0xb0] sm:$0xff]   ;;  %v1605_v43 = vld [vmem:[#allocation7 + $0xb8] sm:$0xff]   ;;  %v1281_v62 = vld [vmem:[%s2184_s2] ss:$0 sm:$0xff] }
  0x79   : > { %1378 = vmatpush3.bf16.msra.mxu0 %v1569_v5  ;;  %1398 = vmatpush3.bf16.msra.mxu1 %v1579_v10  ;;  %v1282_v5 = vld [vmem:[%s2185_s3] ss:$0 sm:$0xff] }
  0x7a   : > { %1379 = vmatprep.subr.bf16.mxu0 %v1783_v0  ;;  %1399 = vmatprep.subr.bf16.mxu1 %v1783_v0 }
  0x7d   : > { %1380 = vmatpush3.bf16.msra.mxu0 %v1570_v7  ;;  %1400 = vmatpush3.bf16.msra.mxu1 %v1581_v12 }
  0x7e   : > { %1381 = vmatprep.subr.bf16.mxu0 %v1783_v0  ;;  %1401 = vmatprep.subr.bf16.mxu1 %v1783_v0 }
  0x81   : > { %1382 = vmatpush3.bf16.msra.mxu0 %v1571_v9  ;;  %1402 = vmatpush3.bf16.msra.mxu1 %v1583_v16 }
  0x82   : > { %1383 = vmatprep.subr.bf16.mxu0 %v1783_v0  ;;  %1403 = vmatprep.subr.bf16.mxu1 %v1783_v0 }
  0x85   : > { %1384 = vmatpush3.bf16.msra.mxu0 %v1572_v11  ;;  %1404 = vmatpush3.bf16.msra.mxu1 %v1585_v18  ;;  %v1608_v18 = vld [vmem:[#allocation7 + $0x50] sm:$0xff]  }
  0x86   : > { %1385 = vmatprep.subr.bf16.mxu0 %v1783_v0  ;;  %1405 = vmatprep.subr.bf16.mxu1 %v1783_v0 }
  0x89   : > { %1386 = vmatpush3.bf16.msra.mxu0 %v1573_v13  ;;  %1406 = vmatpush3.bf16.msra.mxu1 %v1587_v21  ;;  %v1606_v13 = vld [vmem:[#allocation7 + $0x40] sm:$0xff]   ;;  %v1611_v21 = vld [vmem:[#allocation7 + $0x68] sm:$0xff]  }
  0x8a   : > { %1411 = vmatprep.subr.bf16.mxu0 %v1783_v0  ;;  %1431 = vmatprep.subr.bf16.mxu1 %v1783_v0 }
  0x8c   : > { %1388 = vmatmul.mubr.bf16.vlgmr.msra.gmra.mrb[0].mxu0 %v383_v19  ;;  %1408 = vmatmul.mubr.bf16.vlgmr.msra.gmra.mrb[0].mxu1 %v383_v19 }
  0x8d   : > { %1412 = vmatpush3.bf16.msra.mxu0 %v1576_v17  ;;  %1427 = vmatprep.mubr.msk.bf16.mxu0 %vm1784_vm0, %v1783_v0  ;;  %v1607_v17 = vld [vmem:[#allocation7 + $0x48] sm:$0xff]  }
  0x8e   : > { %1413 = vmatprep.subr.bf16.mxu0 %v1783_v0  ;;  %1447 = vmatprep.mubr.msk.bf16.mxu1 %vm1784_vm0, %v1783_v0 }
  0x8f   : > { %1432 = vmatpush3.bf16.msra.mxu1 %v1590_v28 }
  0x90   : > { %1433 = vmatprep.subr.bf16.mxu1 %v1783_v0 }
  0x91   : > { %1414 = vmatpush3.bf16.msra.mxu0 %v1578_v20  ;;  %v1610_v20 = vld [vmem:[#allocation7 + $0x60] sm:$0xff]  }
  0x92   : > { %1415 = vmatprep.subr.bf16.mxu0 %v1783_v0 }
  0x93   : > { %1434 = vmatpush3.bf16.msra.mxu1 %v1592_v30 }
  0x94   : > { %1435 = vmatprep.subr.bf16.mxu1 %v1783_v0 }
  0x95   : > { %1416 = vmatpush3.bf16.msra.mxu0 %v1580_v22  ;;  %v1612_v22 = vld [vmem:[#allocation7 + $0x70] sm:$0xff]  }
  0x96   : > { %1417 = vmatprep.subr.bf16.mxu0 %v1783_v0 }
  0x97   : > { %1436 = vmatpush3.bf16.msra.mxu1 %v1594_v32 }
  0x98   : > { %1437 = vmatprep.subr.bf16.mxu1 %v1783_v0 }
  0x99   : > { %1418 = vmatpush3.bf16.msra.mxu0 %v1582_v23  ;;  %v1613_v23 = vld [vmem:[#allocation7 + $0x78] sm:$0xff]  }
  0x9a   : > { %1419 = vmatprep.subr.bf16.mxu0 %v1783_v0 }
  0x9b   : > { %1438 = vmatpush3.bf16.msra.mxu1 %v1596_v34 }
  0x9c   : > { %1439 = vmatprep.subr.bf16.mxu1 %v1783_v0 }
  0x9d   : > { %1420 = vmatpush3.bf16.msra.mxu0 %v1584_v24 }
  0x9e   : > { %1421 = vmatprep.subr.bf16.mxu0 %v1783_v0 }
  0x9f   : > { %1440 = vmatpush3.bf16.msra.mxu1 %v1598_v36 }
  0xa0   : > { %1441 = vmatprep.subr.bf16.mxu1 %v1783_v0 }
  0xa1   : > { %1422 = vmatpush3.bf16.msra.mxu0 %v1586_v25 }
  0xa2   : > { %1423 = vmatprep.subr.bf16.mxu0 %v1783_v0 }
  0xa3   : > { %1442 = vmatpush3.bf16.msra.mxu1 %v1600_v38 }
  0xa4   : > { %1443 = vmatprep.subr.bf16.mxu1 %v1783_v0 }
  0xa5   : > { %1424 = vmatpush3.bf16.msra.mxu0 %v1588_v26 }
  0xa6   : > { %1425 = vmatprep.subr.bf16.mxu0 %v1783_v0 }
  0xa7   : > { %1444 = vmatpush3.bf16.msra.mxu1 %v1602_v40 }
  0xa8   : > { %1445 = vmatprep.subr.bf16.mxu1 %v1783_v0 }
  0xa9   : > { %1426 = vmatpush3.bf16.msra.mxu0 %v1589_v27 }
  0xaa   : > { %1451 = vmatprep.subr.bf16.mxu0 %v1783_v0 }
  0xab   : > { %1446 = vmatpush3.bf16.msra.mxu1 %v1604_v42 }
  0xac   : > { %1428 = vmatmul.mubr.bf16.vlgmr.msra.gmra.mrb[4].mxu0 %v383_v19  ;;  %1471 = vmatprep.subr.bf16.mxu1 %v1783_v0  ;;  %v1609_v19 = vld [vmem:[#allocation7 + $0x58] sm:$0xff]  }
  0xad   : > { %1467 = vmatprep.mubr.msk.bf16.mxu0 %vm1784_vm0, %v1783_v0  ;;  %1452 = vmatpush3.bf16.msra.mxu0 %v1591_v29 }
  0xae   : > { %1453 = vmatprep.subr.bf16.mxu0 %v1783_v0 }
  0xb1   : > { %1454 = vmatpush3.bf16.msra.mxu0 %v1593_v31 }
  0xb2   : > { %1455 = vmatprep.subr.bf16.mxu0 %v1783_v0 }
  0xb5   : > { %1456 = vmatpush3.bf16.msra.mxu0 %v1595_v33 }
  0xb6   : > { %1457 = vmatprep.subr.bf16.mxu0 %v1783_v0 }
  0xb9   : > { %1458 = vmatpush3.bf16.msra.mxu0 %v1597_v35 }
  0xba   : > { %1459 = vmatprep.subr.bf16.mxu0 %v1783_v0 }
  0xbd   : > { %1460 = vmatpush3.bf16.msra.mxu0 %v1599_v37 }
  0xbe   : > { %1461 = vmatprep.subr.bf16.mxu0 %v1783_v0 }
  0xc1   : > { %1462 = vmatpush3.bf16.msra.mxu0 %v1601_v39 }
  0xc2   : > { %1463 = vmatprep.subr.bf16.mxu0 %v1783_v0 }
  0xc5   : > { %1464 = vmatpush3.bf16.msra.mxu0 %v1603_v41  ;;  %v1307_v41 = vld [vmem:[%s2187_s5] ss:$0 sm:$0xff] }
  0xc6   : > { %1465 = vmatprep.subr.bf16.mxu0 %v1783_v0 }
  0xc9   : > { %1466 = vmatpush3.bf16.msra.mxu0 %v1605_v43 }
 0x15f   : > { %v482_v44 = vpop.f32.mrb[0].mxu0  ;;  %v605_v51 = vpop.f32.mrb[0].mxu1 }
 0x160   : > { %v615_v45 = vrot.slane %v482_v44, 7  ;;  %v1389_v46 = vpop.f32.mrb[1].mxu0  ;;  %v624_v52 = vrot.slane %v605_v51, 1  ;;  %v1409_v53 = vpop.f32.mrb[1].mxu1 }
 0x161   : > { %v485_v47 = vpop.f32.mrb[2].mxu0  ;;  %v608_v54 = vpop.f32.mrb[2].mxu1 }
 0x162   : > { %v616_v48 = vrot.slane %v485_v47, 7  ;;  %v1390_v49 = vpop.f32.mrb[3].mxu0  ;;  %v625_v55 = vrot.slane %v608_v54, 1  ;;  %v1410_v56 = vpop.f32.mrb[3].mxu1  ;;  %v620_v58 = vsel %vm614_vm1, 0.0, %v615_v45 }
 0x163   : > { %v1308_v49 = vld [vmem:[%s2188_s6] ss:$0 sm:$0xff] }
 0x164   : > { %v617_v50 = vsel %vm614_vm1, %v615_v45, %v616_v48  ;;  %v626_v57 = vsel %vm623_vm2, %v624_v52, %v625_v55  ;;  %v629_v4 = vsel %vm623_vm2, %v625_v55, 0.0 }
 0x17f   : > { %v712_v59 = vpop.f32.mrb[4].mxu0 }
 0x180   : > { %v713_v60 = vadd.f32 %v712_v59, %v620_v58  ;;  %v1429_v61 = vpop.f32.mrb[5].mxu0  ;;  %v1102_v59 = vld [vmem:[%s2189_s7] sm:$0x1] }
 0x181   : > { %v715_v63 = vpop.f32.mrb[6].mxu0  ;;  %v1111_v61 = vld [vmem:[%s2189_s7 + $0x1] sm:$0x1] }
 0x182   : > { %v719_v1 = vadd.f32 %v713_v60, %v626_v57  ;;  %v716_v2 = vadd.f32 %v715_v63, %v617_v50  ;;  %v1430_v3 = vpop.f32.mrb[7].mxu0 }
 0x184   : > { %v728_v6 = vmul.f32 %v1281_v62, %v719_v1  ;;  %v720_v7 = vadd.f32 %v716_v2, %v629_v4 }
 0x186   : > { %v737_v8 = vadd.f32 %v1282_v5, %v728_v6  ;;  %v729_v9 = vmul.f32 %v1281_v62, %v720_v7  ;;  %v1117_v6 = vld [vmem:[%s2190_s8 + $0x1] sm:$0x1] }
 0x188   : > { %v738_v10 = vadd.f32 %v1282_v5, %v729_v9  ;;  %v739_v11 = vmax.f32 %v737_v8, 0.0  ;;  %v1108_v5 = vld [vmem:[%s2190_s8] sm:$0x1] }
 0x18a   : > { %v740_v12 = vmax.f32 %v738_v10, 0.0 }
 0x18c   : > { %v741_v16 = vpack.c.bf16 %v740_v12, %v739_v11 }
 0x18e   : > { %1448 = vmatmul.mubr.bf16.vlgmr.msra.gmra.mrb[4].mxu1 %v741_v16  ;;  %1468 = vmatmul.mubr.bf16.vlgmr.msra.gmra.mrb[8].mxu0 %v741_v16 }
 0x18f   : > { %1472 = vmatpush3.bf16.msra.mxu1 %v1606_v13  ;;  %1487 = vmatprep.mubr.msk.bf16.mxu1 %vm1784_vm0, %v1783_v0 }
 0x190   : > { %1473 = vmatprep.subr.bf16.mxu1 %v1783_v0 }
 0x193   : > { %1474 = vmatpush3.bf16.msra.mxu1 %v1607_v17  ;;  %v1126_v17 = vlaneseq }
 0x194   : > { %1475 = vmatprep.subr.bf16.mxu1 %v1783_v0 }
 0x197   : > { %1476 = vmatpush3.bf16.msra.mxu1 %v1608_v18  ;;  %v1127_v18 = vshrl.u32 %v1126_v17, 7 }
 0x198   : > { %1477 = vmatprep.subr.bf16.mxu1 %v1783_v0 }
 0x19b   : > { %1478 = vmatpush3.bf16.msra.mxu1 %v1609_v19  ;;  %v1128_v19 = vsub.s32 0, %v1127_v18 }
 0x19c   : > { %1479 = vmatprep.subr.bf16.mxu1 %v1783_v0 }
 0x19f   : > { %1480 = vmatpush3.bf16.msra.mxu1 %v1610_v20 }
 0x1a0   : > { %1481 = vmatprep.subr.bf16.mxu1 %v1783_v0 }
 0x1a3   : > { %1482 = vmatpush3.bf16.msra.mxu1 %v1611_v21 }
 0x1a4   : > { %1483 = vmatprep.subr.bf16.mxu1 %v1783_v0 }
 0x1a7   : > { %1484 = vmatpush3.bf16.msra.mxu1 %v1612_v22 }
 0x1a8   : > { %1485 = vmatprep.subr.bf16.mxu1 %v1783_v0 }
 0x1ab   : > { %1486 = vmatpush3.bf16.msra.mxu1 %v1613_v23 }
 0x1ae   : > { %1488 = vmatmul.mubr.bf16.vlgmr.msra.gmra.mrb[8].mxu1 %v741_v16 }
 0x261   : > { %v840_v24 = vpop.f32.mrb[4].mxu1  ;;  %v963_v25 = vpop.f32.mrb[8].mxu0 }
 0x262   : > { %v1449_v26 = vpop.f32.mrb[5].mxu1  ;;  %v1469_v27 = vpop.f32.mrb[9].mxu0  ;;  %v972_v30 = vrot.slane %v840_v24, 7  ;;  %v980_v31 = vrot.slane %v963_v25, 1 }
 0x263   : > { %v843_v28 = vpop.f32.mrb[6].mxu1  ;;  %v966_v29 = vpop.f32.mrb[10].mxu0 }
 0x264   : > { %v973_v32 = vrot.slane %v843_v28, 7  ;;  %v981_v33 = vrot.slane %v966_v29, 1  ;;  %v1450_v34 = vpop.f32.mrb[7].mxu1  ;;  %v1470_v35 = vpop.f32.mrb[11].mxu0  ;;  %v977_v0 = vsel %vm614_vm1, 0.0, %v972_v30 }
 0x266   : > { %v982_v36 = vsel %vm623_vm2, %v980_v31, %v981_v33  ;;  %v974_v37 = vsel %vm614_vm1, %v972_v30, %v973_v32  ;;  %v985_v46 = vsel %vm623_vm2, %v981_v33, 0.0 }
 0x281   : > { %v1068_v38 = vpop.f32.mrb[8].mxu1 }
 0x282   : > { %v1069_v39 = vadd.f32 %v1068_v38, %v977_v0  ;;  %v1489_v40 = vpop.f32.mrb[9].mxu1 }
 0x283   : > { %v1071_v42 = vpop.f32.mrb[10].mxu1 }
 0x284   : > { %v1075_v43 = vadd.f32 %v1069_v39, %v982_v36  ;;  %v1072_v44 = vadd.f32 %v1071_v42, %v974_v37  ;;  %v1490_v45 = vpop.f32.mrb[11].mxu1 }
 0x286   : > { %v1084_v47 = vmul.f32 %v1307_v41, %v1075_v43  ;;  %v1076_v48 = vadd.f32 %v1072_v44, %v985_v46 }
 0x288   : > { %v1085_v50 = vmul.f32 %v1307_v41, %v1076_v48  ;;  %v1093_v51 = vadd.f32 %v1308_v49, %v1084_v47 }
 0x28a   : > { %v1094_v52 = vadd.f32 %v1308_v49, %v1085_v50 }
 0x28c   : > { %v1095_v53 = vadd.f32 %v1094_v52, %v1093_v51 }
 0x28e   : > { %v1096_v54 = vrot.slane %v1095_v53, 4 }
 0x290   : > { %v1097_v55 = vadd.f32 %v1096_v54, %v1095_v53 }
 0x292   : > { %v1098_v56 = vrot.slane %v1097_v55, 2 }
 0x294   : > { %v1099_v57 = vadd.f32 %v1098_v56, %v1097_v55 }
 0x296   : > { %v1100_v58 = vrot.slane %v1099_v57, 1 }
 0x298   : > { %v1101_v60 = vadd.f32 %v1100_v58, %v1099_v57 }
 0x29a   : > { %v1103_v62 = vmul.f32 %v1102_v59, %v1101_v60  ;;  %v1112_v1 = vmul.f32 %v1111_v61, %v1101_v60 }
 0x29c   : > { %v1104_v63 = vsel %vm614_vm1, %v1103_v62, 0.0  ;;  %v1113_v2 = vsel %vm614_vm1, %v1112_v1, 0.0 }
 0x29d   : > { %1105 = vadd.xlane.f32.xlu0 %v1104_v63 }
 0x2a1   : > { %1114 = vadd.xlane.f32.xlu0 %v1113_v2 }
 0x32a   : > { %v1106_v3 = vpop.xlane.xlu0 %1105 }
 0x32b   : > { %v1107_v4 = vmax.f32 %v1106_v3, 0.0 }
 0x32d   : > { %v1109_v9 = vmul.f32 %v1108_v5, %v1107_v4 }
 0x32e   : > { %v1115_v7 = vpop.xlane.xlu0 %1114 }
 0x32f   : > { %v1116_v8 = vmax.f32 %v1115_v7, 0.0 }
 0x331   : > { %v1118_v10 = vmul.f32 %v1117_v6, %v1116_v8 }
 0x333   : > { %v1119_v11 = vadd.f32 %v1118_v10, %v1109_v9 }
 0x335   : > { %v1309_v12 = vmul.f32 -1.442695, %v1119_v11 }
 0x337   : > { %1614 = vpow2.f32 %v1309_v12 }
 0x341   : > { %v1615_v13 = vpop.eup %1614 }
 0x342   : > { %v1123_v16 = vadd.f32 1.0, %v1615_v13 }
 0x344   : > { %1616 = vrcp.f32 %v1123_v16 }
 0x34e   : > { %v1617_v20 = vpop.eup %1616 }
 0x34f   : > { %v1129_v21 = vrot.slane %v1617_v20, %v1128_v19 }
 0x351   : > { %v1130_v22 = vmul.f32 %v1129_v21, %v1093_v51  ;;  %v1131_v23 = vmul.f32 %v1129_v21, %v1094_v52 }
 0x353   : > { %v1132_v24 = vadd.f32 %v1130_v22, %v2043_v14  ;;  %v1133_v25 = vadd.f32 %v1131_v23, %v2046_v15 }
 0x355   : > { %v1134_v26 = vmax.f32 %v1132_v24, 0.0  ;;  %v1135_v27 = vmax.f32 %v1133_v25, 0.0 }
 0x357   : > { %1136 = vst [vmem:[%s379_s21] sm:$0xff] %v1134_v26  ;;  %1137 = vst [vmem:[%s379_s21 + $0x8] sm:$0xff] %v1135_v27 }
 0x358   : > { %1717 = shalt.err (!%p1714_p2)
}
 0x359   : > { %s1718_s16 = scalar_lea.hbm %s2136_s22, 256  ;;  %s1722_s21 = scalar_lea.hbm %s2191_s9, 512 }
 0x35a   : > { %p1719_p13 = scmp.ne.s32.totalorder %s2136_s22, %s1718_s16  ;;  %p1723_p4 = scmp.lt.u32.totalorder %s2136_s22, %s2191_s9 }
 0x35b   : > { %p1724_p5 = scmp.lt.u32.totalorder %s1722_s21, %s1718_s16  ;;  %p1726_p11 = scmp.lt.u32.totalorder %s1718_s16, %s2136_s22 }
 0x35c   : > { %p1720_p6 = pnand %p1719_p13, %p2207_p0 }
 0x35d   : > { %p1725_p8 = por %p1724_p5, %p1723_p4 }
 0x35e   : > { %p1721_p10 = pneg %p1720_p6 }
 0x35f   : > { %p1727_p1 = por %p1726_p11, %p1725_p8 }
 0x361   : > { %p1728_p3 = pnand %p1727_p1, %p1721_p10 }
 0x363   : > { %1731 = shalt.err (!%p1728_p3)
}
 0x364   : > { %s1786_s28 = smov 128   ;;  %s1787_s15 = smov 8  }
 0x365   : > { %1501 = dma.vmem_to_hbm [thread:$0]  (%p2207_p0), %s2138_s25, 256, %s2136_s22, %s1139_s13, %s1786_s28, %s1786_s28, %s1787_s15  }
 0x366 PF: > { %s2208_s17 = sld [smem:[#allocation12_spill]]  ;;  %s1167_s14 = sand.u32 1, %s1762_s30  }
 0x367   : > { %p2210_p9 = scmp.ge.s32.totalorder %s1774_s12, 2  ;;  %s1168_s16 = scalar_lea.sflag [#allocation4], %s1167_s14 }
 0x36c   : > { %p2209_p7 = scmp.ne.s32.totalorder %s2208_s17, 0 }
 0x36e   : > { %p1515_p12 = pnand %p2210_p9, %p2209_p7 }
 0x370   : > { %1757 = dma.done.wait (!%p1515_p12), %s1168_s16, 256  }
 0x371   : > { %1759 = vsyncadd (!%p1515_p12), %s1168_s16, 4294967040  ;;  %p23_p2 = scmp.ge.s32.totalorder %s1948_s24, 4   ;;  %s2211_s30 = smov %s1766_s10 }
 0x372   : > { %s2212_s10 = smov %s1770_s11  ;;  %s2213_s11 = smov %s1964_s27 }
 0x373   : > { %s2214_s12 = smov %s1948_s24  ;;  %25 = sbr.rel (!%p23_p2) target bundleno = 6 (0x6), region = 113 }
 0x37a   :  { %1173 = vsyncpa [#allocation3], 1 }
 0x37b   :  { %1175 = vsyncpa [#allocation3 + $0x1], 1 }
 0x37c   :  { %1176 = vsyncpa [#allocation6], 1 }
 0x37d   :  { %1177 = vsyncpa [#allocation4], 1 }
 0x37e   :  { %1179 = vsyncpa [#allocation4 + $0x1], 1 }

</bundles_post_ra>
